<compile_context>
chip_gen: v7x
topology: tpu7x:2x2x1
jax: 0.10.0
libtpu: 0.0.40
codegen_flags: <defaults>
</compile_context>

<pallas_src>
import functools

import numpy as np

import jax
import jax.numpy as jnp
from jax import lax
from jax.experimental import pallas as pl
from jax.experimental.pallas import tpu as pltpu

EPS = 1e-5


def _sepconv_fused_kernel(x_ref, mw1_ref, mw2_ref, pw1_ref, pw2_ref,
                          sh1_ref, sh2_ref, o_ref, *, shifts):
    """Fused SepConv forward for one batch-packed block.

    x_ref:   (rows_in, HW)        packed input (rows = Nb*C sublanes)
    mw*_ref: (K*K, rows, HW)      masked depthwise tap weights (halo folded in)
    pw*_ref: (2, rows_out, rows_in) block-diag pointwise (BN scale folded),
                                   bf16-split into [hi, lo] parts
    sh*_ref: (rows_out, 1)        folded BN shift
    o_ref:   (rows_out, HW)       packed output
    """

    def stage(x, mw_ref, pw_ref, sh_ref):
        # ReLU once (hoisted out of the tap loop).
        xr = jnp.maximum(x, 0.0)
        # Depthwise KxK: one lane roll (XLU) + one FMA (VPU) per tap; the
        # zero-padding halo is already folded into mw (mask * tap weight).
        acc = None
        for k, shift in enumerate(shifts):
            shifted = xr if shift == 0 else pltpu.roll(xr, shift, axis=1)
            term = shifted * mw_ref[k]
            acc = term if acc is None else acc + term
        # Pointwise 1x1 + folded-BN scale as one block-diagonal MXU matmul on
        # the vreg-resident accumulator.  bf16-split (3 passes) keeps full
        # f32 accuracy independent of the default MXU f32 precision.
        acc_hi = acc.astype(jnp.bfloat16).astype(jnp.float32)
        acc_lo = acc - acc_hi
        pw_hi = pw_ref[0]
        pw_lo = pw_ref[1]
        y = (jnp.dot(pw_hi, acc_hi, preferred_element_type=jnp.float32)
             + jnp.dot(pw_hi, acc_lo, preferred_element_type=jnp.float32)
             + jnp.dot(pw_lo, acc_hi, preferred_element_type=jnp.float32))
        return y + sh_ref[...]          # folded BN shift, broadcast over lanes

    y1 = stage(x_ref[...].astype(jnp.float32), mw1_ref, pw1_ref, sh1_ref)
    o_ref[...] = stage(y1, mw2_ref, pw2_ref, sh2_ref).astype(o_ref.dtype)


def _fold_bn(gamma, beta, mean, var):
    scale = gamma / jnp.sqrt(var + EPS)
    return scale, beta - mean * scale


def _pick_nb(n, c):
    """Smallest batch-packing factor Nb (divisor of n) with Nb*c % 8 == 0.

    Smallest such Nb keeps sublanes full while maximizing the number of grid
    steps (pipelining / v7x megacore when N is large enough)."""
    for nb in range(1, n + 1):
        if n % nb == 0 and (nb * c) % 8 == 0:
            return nb
    return n


def _split_bf16(w):
    hi = w.astype(jnp.bfloat16).astype(jnp.float32)
    return jnp.stack([hi, w - hi])      # (2, rows_out, rows_in)


def sep_conv_forward(x_nchw, params, *, kernel_size=3, padding=1):
    """Full SepConv forward (eval-mode BN). x_nchw: (N, C, H, W) float32."""
    # TODO(synk): stride != 1 (spatially subsampling first depthwise) is not
    # implemented; this kernel covers the stride=1, padding=(K-1)//2 case.
    N, C, H, W = x_nchw.shape
    HW = H * W
    K = kernel_size
    R = K // 2
    assert K % 2 == 1 and padding == R, "only 'same' stride-1 SepConv supported"

    dw1 = params["dw1"].reshape(C, K * K).astype(jnp.float32)       # (C, K*K)
    dw2 = params["dw2"].reshape(C, K * K).astype(jnp.float32)
    pw1 = params["pw1"][:, :, 0, 0].astype(jnp.float32)             # (C, C)
    pw2 = params["pw2"][:, :, 0, 0].astype(jnp.float32)             # (Cout, C)
    c_out = pw2.shape[0]

    # Fold the inference-mode BN scale into the pointwise weights.
    s1, sh1 = _fold_bn(params["g1"], params["b1"], params["m1"], params["v1"])
    s2, sh2 = _fold_bn(params["g2"], params["b2"], params["m2"], params["v2"])
    pw1 = pw1 * s1[:, None]
    pw2 = pw2 * s2[:, None]

    # Batch packing into sublanes.
    nb = _pick_nb(N, C)
    G = N // nb
    r_in, r_out = nb * C, nb * c_out

    # Per-tap lane shift + host-precomputed validity mask (== zero-padding the
    # post-ReLU tensor by R pixels); the mask is folded into the tap weights.
    hh, ww = np.meshgrid(np.arange(H), np.arange(W), indexing="ij")
    hh, ww = hh.reshape(-1), ww.reshape(-1)
    shifts, masks = [], []
    for dy in range(-R, R + 1):
        for dx in range(-R, R + 1):
            shifts.append(int((-(dy * W + dx)) % HW))
            masks.append(((hh + dy >= 0) & (hh + dy < H) &
                          (ww + dx >= 0) & (ww + dx < W)).astype(np.float32))
    mask = jnp.asarray(np.stack(masks))                              # (K*K, HW)
    dw1_p = jnp.tile(dw1, (nb, 1))                                   # (r_in, K*K)
    dw2_p = jnp.tile(dw2, (nb, 1))
    mw1 = dw1_p.T[:, :, None] * mask[:, None, :]                     # (K*K, r_in, HW)
    mw2 = dw2_p.T[:, :, None] * mask[:, None, :]

    # Block-diagonal (batch-packed) pointwise weights, bf16-split for the MXU.
    eye = jnp.eye(nb, dtype=jnp.float32)
    pw1_b = _split_bf16(jnp.kron(eye, pw1))                          # (2, r_in, r_in)
    pw2_b = _split_bf16(jnp.kron(eye, pw2))                          # (2, r_out, r_in)
    sh1_p = jnp.tile(sh1.astype(jnp.float32), nb).reshape(r_in, 1)
    sh2_p = jnp.tile(sh2.astype(jnp.float32), nb).reshape(r_out, 1)

    # Free, contiguous reshape to the lane-dense batch-packed layout.
    x3 = x_nchw.reshape(G, r_in, HW)

    out = pl.pallas_call(
        functools.partial(_sepconv_fused_kernel, shifts=tuple(shifts)),
        out_shape=jax.ShapeDtypeStruct((G, r_out, HW), jnp.float32),
        grid=(G,),
        in_specs=[
            pl.BlockSpec((None, r_in, HW), lambda g: (g, 0, 0)),     # x
            pl.BlockSpec((K * K, r_in, HW), lambda g: (0, 0, 0)),    # mw1
            pl.BlockSpec((K * K, r_in, HW), lambda g: (0, 0, 0)),    # mw2
            pl.BlockSpec((2, r_in, r_in), lambda g: (0, 0, 0)),      # pw1 hi/lo
            pl.BlockSpec((2, r_out, r_in), lambda g: (0, 0, 0)),     # pw2 hi/lo
            pl.BlockSpec((r_in, 1), lambda g: (0, 0)),               # sh1
            pl.BlockSpec((r_out, 1), lambda g: (0, 0)),              # sh2
        ],
        out_specs=pl.BlockSpec((None, r_out, HW), lambda g: (g, 0, 0)),
        compiler_params=pltpu.CompilerParams(
            dimension_semantics=("parallel",)),
    )(x3, mw1, mw2, pw1_b, pw2_b, sh1_p, sh2_p)
    return out.reshape(N, c_out, H, W)


def _ref_forward(x, p, *, kernel_size=3, padding=1):
    """Pure-JAX reference mirroring the PyTorch module (eval-mode BN)."""
    C = x.shape[1]
    dn = ("NCHW", "OIHW", "NCHW")
    hp = lax.Precision.HIGHEST
    pad = [(padding, padding)] * 2

    def bn(y, g, b, m, v):
        g, b, m, v = (a.reshape(1, -1, 1, 1) for a in (g, b, m, v))
        return (y - m) / jnp.sqrt(v + EPS) * g + b

    y = jnp.maximum(x, 0.0)
    y = lax.conv_general_dilated(y, p["dw1"], (1, 1), pad, dimension_numbers=dn,
                                 feature_group_count=C, precision=hp)
    y = lax.conv_general_dilated(y, p["pw1"], (1, 1), [(0, 0), (0, 0)],
                                 dimension_numbers=dn, precision=hp)
    y = bn(y, p["g1"], p["b1"], p["m1"], p["v1"])
    y = jnp.maximum(y, 0.0)
    y = lax.conv_general_dilated(y, p["dw2"], (1, 1), pad, dimension_numbers=dn,
                                 feature_group_count=C, precision=hp)
    y = lax.conv_general_dilated(y, p["pw2"], (1, 1), [(0, 0), (0, 0)],
                                 dimension_numbers=dn, precision=hp)
    y = bn(y, p["g2"], p["b2"], p["m2"], p["v2"])
    return y


if __name__ == "__main__":
    # Small shapes consistent with the module: N=2, C_in=C_out=4, H=W=16,
    # SepConv(C_in=4, C_out=4, kernel_size=3, stride=1, padding=1).
    N, C, C_out, H, W = 2, 4, 4, 16, 16
    K = 3
    ks = jax.random.split(jax.random.PRNGKey(0), 13)

    # TODO(synk): BatchNorm is implemented in inference mode (running stats);
    # training-mode batch statistics are not reproduced here.
    params = {
        # depthwise 3x3 weights (groups=C, bias=False): (C, 1, 3, 3)
        "dw1": 0.2 * jax.random.normal(ks[0], (C, 1, K, K), jnp.float32),
        "dw2": 0.2 * jax.random.normal(ks[1], (C, 1, K, K), jnp.float32),
        # pointwise 1x1 weights: (C_out, C_in, 1, 1)
        "pw1": 0.3 * jax.random.normal(ks[2], (C, C, 1, 1), jnp.float32),
        "pw2": 0.3 * jax.random.normal(ks[3], (C_out, C, 1, 1), jnp.float32),
        # BatchNorm2d params / running stats
        "g1": 1.0 + 0.1 * jax.random.normal(ks[4], (C,), jnp.float32),
        "b1": 0.1 * jax.random.normal(ks[5], (C,), jnp.float32),
        "m1": 0.1 * jax.random.normal(ks[6], (C,), jnp.float32),
        "v1": 0.5 + jax.random.uniform(ks[7], (C,), jnp.float32),
        "g2": 1.0 + 0.1 * jax.random.normal(ks[8], (C_out,), jnp.float32),
        "b2": 0.1 * jax.random.normal(ks[9], (C_out,), jnp.float32),
        "m2": 0.1 * jax.random.normal(ks[10], (C_out,), jnp.float32),
        "v2": 0.5 + jax.random.uniform(ks[11], (C_out,), jnp.float32),
    }
    x = jax.random.normal(ks[12], (N, C, H, W), jnp.float32)

    out = jax.block_until_ready(jax.jit(sep_conv_forward)(x, params))
    ref = jax.block_until_ready(_ref_forward(x, params))

    assert out.shape == (N, C_out, H, W)
    max_err = float(jnp.max(jnp.abs(out - ref)))
    assert jnp.allclose(out, ref, atol=5e-4, rtol=5e-4), f"max_err={max_err}"
    print("KERNEL_OK")
</pallas_src>

<mosaic_0001>
module attributes {stable_mosaic.version = 11 : i64} {
  func.func @_sepconv_fused_kernel(%arg0: i32, %arg1: memref<1x8x256xf32, #tpu.memory_space<vmem>>, %arg2: memref<9x8x256xf32, #tpu.memory_space<vmem>>, %arg3: memref<9x8x256xf32, #tpu.memory_space<vmem>>, %arg4: memref<2x8x8xf32, #tpu.memory_space<vmem>>, %arg5: memref<2x8x8xf32, #tpu.memory_space<vmem>>, %arg6: memref<8x1xf32, #tpu.memory_space<vmem>>, %arg7: memref<8x1xf32, #tpu.memory_space<vmem>>, %arg8: memref<1x8x256xf32, #tpu.memory_space<vmem>>) attributes {dimension_semantics = [#tpu.dimension_semantics<parallel>], iteration_bounds = array<i64: 1>, scalar_prefetch = 0 : i64, scratch_operands = 0 : i64, tpu.core_type = #tpu.core_type<tc>, window_params = [{transform_indices = @transform_0, window_bounds = array<i64: 1, 8, 256>}, {pipeline_mode = #tpu.pipeline_mode<synchronous>, transform_indices = @transform_1, window_bounds = array<i64: 9, 8, 256>}, {pipeline_mode = #tpu.pipeline_mode<synchronous>, transform_indices = @transform_2, window_bounds = array<i64: 9, 8, 256>}, {pipeline_mode = #tpu.pipeline_mode<synchronous>, transform_indices = @transform_3, window_bounds = array<i64: 2, 8, 8>}, {pipeline_mode = #tpu.pipeline_mode<synchronous>, transform_indices = @transform_4, window_bounds = array<i64: 2, 8, 8>}, {pipeline_mode = #tpu.pipeline_mode<synchronous>, transform_indices = @transform_5, window_bounds = array<i64: 8, 1>}, {pipeline_mode = #tpu.pipeline_mode<synchronous>, transform_indices = @transform_6, window_bounds = array<i64: 8, 1>}, {transform_indices = @transform_7, window_bounds = array<i64: 1, 8, 256>}]} {
    %c0 = arith.constant 0 : index
    %c0_0 = arith.constant 0 : index
    %c0_1 = arith.constant 0 : index
    %0 = vector.load %arg1[%c0, %c0_0, %c0_1] : memref<1x8x256xf32, #tpu.memory_space<vmem>>, vector<1x8x256xf32>
    %1 = vector.shape_cast %0 : vector<1x8x256xf32> to vector<8x256xf32>
    %cst = arith.constant 0.000000e+00 : f32
    %2 = vector.broadcast %cst : f32 to vector<8x256xf32>
    %3 = arith.maximumf %1, %2 : vector<8x256xf32>
    %c17_i32 = arith.constant 17 : i32
    %4 = tpu.dynamic_rotate %3 by %c17_i32 dim 1 : vector<8x256xf32>, i32 -> vector<8x256xf32>
    %c0_2 = arith.constant 0 : index
    %c0_3 = arith.constant 0 : index
    %c0_4 = arith.constant 0 : index
    %5 = vector.load %arg2[%c0_2, %c0_3, %c0_4] : memref<9x8x256xf32, #tpu.memory_space<vmem>>, vector<1x8x256xf32>
    %6 = vector.shape_cast %5 : vector<1x8x256xf32> to vector<8x256xf32>
    %7 = arith.mulf %4, %6 : vector<8x256xf32>
    %c16_i32 = arith.constant 16 : i32
    %8 = tpu.dynamic_rotate %3 by %c16_i32 dim 1 : vector<8x256xf32>, i32 -> vector<8x256xf32>
    %c1 = arith.constant 1 : index
    %c0_5 = arith.constant 0 : index
    %c0_6 = arith.constant 0 : index
    %9 = vector.load %arg2[%c1, %c0_5, %c0_6] : memref<9x8x256xf32, #tpu.memory_space<vmem>>, vector<1x8x256xf32>
    %10 = vector.shape_cast %9 : vector<1x8x256xf32> to vector<8x256xf32>
    %11 = arith.mulf %8, %10 : vector<8x256xf32>
    %12 = arith.addf %7, %11 : vector<8x256xf32>
    %c15_i32 = arith.constant 15 : i32
    %13 = tpu.dynamic_rotate %3 by %c15_i32 dim 1 : vector<8x256xf32>, i32 -> vector<8x256xf32>
    %c2 = arith.constant 2 : index
    %c0_7 = arith.constant 0 : index
    %c0_8 = arith.constant 0 : index
    %14 = vector.load %arg2[%c2, %c0_7, %c0_8] : memref<9x8x256xf32, #tpu.memory_space<vmem>>, vector<1x8x256xf32>
    %15 = vector.shape_cast %14 : vector<1x8x256xf32> to vector<8x256xf32>
    %16 = arith.mulf %13, %15 : vector<8x256xf32>
    %17 = arith.addf %12, %16 : vector<8x256xf32>
    %c1_i32 = arith.constant 1 : i32
    %18 = tpu.dynamic_rotate %3 by %c1_i32 dim 1 : vector<8x256xf32>, i32 -> vector<8x256xf32>
    %c3 = arith.constant 3 : index
    %c0_9 = arith.constant 0 : index
    %c0_10 = arith.constant 0 : index
    %19 = vector.load %arg2[%c3, %c0_9, %c0_10] : memref<9x8x256xf32, #tpu.memory_space<vmem>>, vector<1x8x256xf32>
    %20 = vector.shape_cast %19 : vector<1x8x256xf32> to vector<8x256xf32>
    %21 = arith.mulf %18, %20 : vector<8x256xf32>
    %22 = arith.addf %17, %21 : vector<8x256xf32>
    %c4 = arith.constant 4 : index
    %c0_11 = arith.constant 0 : index
    %c0_12 = arith.constant 0 : index
    %23 = vector.load %arg2[%c4, %c0_11, %c0_12] : memref<9x8x256xf32, #tpu.memory_space<vmem>>, vector<1x8x256xf32>
    %24 = vector.shape_cast %23 : vector<1x8x256xf32> to vector<8x256xf32>
    %25 = arith.mulf %3, %24 : vector<8x256xf32>
    %26 = arith.addf %22, %25 : vector<8x256xf32>
    %c255_i32 = arith.constant 255 : i32
    %27 = tpu.dynamic_rotate %3 by %c255_i32 dim 1 : vector<8x256xf32>, i32 -> vector<8x256xf32>
    %c5 = arith.constant 5 : index
    %c0_13 = arith.constant 0 : index
    %c0_14 = arith.constant 0 : index
    %28 = vector.load %arg2[%c5, %c0_13, %c0_14] : memref<9x8x256xf32, #tpu.memory_space<vmem>>, vector<1x8x256xf32>
    %29 = vector.shape_cast %28 : vector<1x8x256xf32> to vector<8x256xf32>
    %30 = arith.mulf %27, %29 : vector<8x256xf32>
    %31 = arith.addf %26, %30 : vector<8x256xf32>
    %c241_i32 = arith.constant 241 : i32
    %32 = tpu.dynamic_rotate %3 by %c241_i32 dim 1 : vector<8x256xf32>, i32 -> vector<8x256xf32>
    %c6 = arith.constant 6 : index
    %c0_15 = arith.constant 0 : index
    %c0_16 = arith.constant 0 : index
    %33 = vector.load %arg2[%c6, %c0_15, %c0_16] : memref<9x8x256xf32, #tpu.memory_space<vmem>>, vector<1x8x256xf32>
    %34 = vector.shape_cast %33 : vector<1x8x256xf32> to vector<8x256xf32>
    %35 = arith.mulf %32, %34 : vector<8x256xf32>
    %36 = arith.addf %31, %35 : vector<8x256xf32>
    %c240_i32 = arith.constant 240 : i32
    %37 = tpu.dynamic_rotate %3 by %c240_i32 dim 1 : vector<8x256xf32>, i32 -> vector<8x256xf32>
    %c7 = arith.constant 7 : index
    %c0_17 = arith.constant 0 : index
    %c0_18 = arith.constant 0 : index
    %38 = vector.load %arg2[%c7, %c0_17, %c0_18] : memref<9x8x256xf32, #tpu.memory_space<vmem>>, vector<1x8x256xf32>
    %39 = vector.shape_cast %38 : vector<1x8x256xf32> to vector<8x256xf32>
    %40 = arith.mulf %37, %39 : vector<8x256xf32>
    %41 = arith.addf %36, %40 : vector<8x256xf32>
    %c239_i32 = arith.constant 239 : i32
    %42 = tpu.dynamic_rotate %3 by %c239_i32 dim 1 : vector<8x256xf32>, i32 -> vector<8x256xf32>
    %c8 = arith.constant 8 : index
    %c0_19 = arith.constant 0 : index
    %c0_20 = arith.constant 0 : index
    %43 = vector.load %arg2[%c8, %c0_19, %c0_20] : memref<9x8x256xf32, #tpu.memory_space<vmem>>, vector<1x8x256xf32>
    %44 = vector.shape_cast %43 : vector<1x8x256xf32> to vector<8x256xf32>
    %45 = arith.mulf %42, %44 : vector<8x256xf32>
    %46 = arith.addf %41, %45 : vector<8x256xf32>
    %47 = arith.truncf %46 : vector<8x256xf32> to vector<8x256xbf16>
    %48 = arith.extf %47 : vector<8x256xbf16> to vector<8x256xf32>
    %49 = arith.subf %46, %48 : vector<8x256xf32>
    %c0_21 = arith.constant 0 : index
    %c0_22 = arith.constant 0 : index
    %c0_23 = arith.constant 0 : index
    %50 = vector.load %arg4[%c0_21, %c0_22, %c0_23] : memref<2x8x8xf32, #tpu.memory_space<vmem>>, vector<1x8x8xf32>
    %51 = vector.shape_cast %50 : vector<1x8x8xf32> to vector<8x8xf32>
    %c1_24 = arith.constant 1 : index
    %c0_25 = arith.constant 0 : index
    %c0_26 = arith.constant 0 : index
    %52 = vector.load %arg4[%c1_24, %c0_25, %c0_26] : memref<2x8x8xf32, #tpu.memory_space<vmem>>, vector<1x8x8xf32>
    %53 = vector.shape_cast %52 : vector<1x8x8xf32> to vector<8x8xf32>
    %cst_27 = arith.constant dense<0.000000e+00> : vector<8x256xf32>
    %54 = tpu.matmul %51, %48, %cst_27 {dimension_numbers = #tpu.dot_dimension_numbers<[1], [0], [0], [1], [0, 0, 1, 1], [], []>} : vector<8x8xf32>, vector<8x256xf32>, vector<8x256xf32> -> vector<8x256xf32>
    %cst_28 = arith.constant dense<0.000000e+00> : vector<8x256xf32>
    %55 = tpu.matmul %51, %49, %cst_28 {dimension_numbers = #tpu.dot_dimension_numbers<[1], [0], [0], [1], [0, 0, 1, 1], [], []>} : vector<8x8xf32>, vector<8x256xf32>, vector<8x256xf32> -> vector<8x256xf32>
    %56 = arith.addf %54, %55 : vector<8x256xf32>
    %cst_29 = arith.constant dense<0.000000e+00> : vector<8x256xf32>
    %57 = tpu.matmul %53, %48, %cst_29 {dimension_numbers = #tpu.dot_dimension_numbers<[1], [0], [0], [1], [0, 0, 1, 1], [], []>} : vector<8x8xf32>, vector<8x256xf32>, vector<8x256xf32> -> vector<8x256xf32>
    %58 = arith.addf %56, %57 : vector<8x256xf32>
    %c0_30 = arith.constant 0 : index
    %c0_31 = arith.constant 0 : index
    %59 = vector.load %arg6[%c0_30, %c0_31] : memref<8x1xf32, #tpu.memory_space<vmem>>, vector<8x1xf32>
    %60 = vector.broadcast %59 : vector<8x1xf32> to vector<8x256xf32>
    %61 = arith.addf %58, %60 : vector<8x256xf32>
    %cst_32 = arith.constant 0.000000e+00 : f32
    %62 = vector.broadcast %cst_32 : f32 to vector<8x256xf32>
    %63 = arith.maximumf %61, %62 : vector<8x256xf32>
    %c17_i32_33 = arith.constant 17 : i32
    %64 = tpu.dynamic_rotate %63 by %c17_i32_33 dim 1 : vector<8x256xf32>, i32 -> vector<8x256xf32>
    %c0_34 = arith.constant 0 : index
    %c0_35 = arith.constant 0 : index
    %c0_36 = arith.constant 0 : index
    %65 = vector.load %arg3[%c0_34, %c0_35, %c0_36] : memref<9x8x256xf32, #tpu.memory_space<vmem>>, vector<1x8x256xf32>
    %66 = vector.shape_cast %65 : vector<1x8x256xf32> to vector<8x256xf32>
    %67 = arith.mulf %64, %66 : vector<8x256xf32>
    %c16_i32_37 = arith.constant 16 : i32
    %68 = tpu.dynamic_rotate %63 by %c16_i32_37 dim 1 : vector<8x256xf32>, i32 -> vector<8x256xf32>
    %c1_38 = arith.constant 1 : index
    %c0_39 = arith.constant 0 : index
    %c0_40 = arith.constant 0 : index
    %69 = vector.load %arg3[%c1_38, %c0_39, %c0_40] : memref<9x8x256xf32, #tpu.memory_space<vmem>>, vector<1x8x256xf32>
    %70 = vector.shape_cast %69 : vector<1x8x256xf32> to vector<8x256xf32>
    %71 = arith.mulf %68, %70 : vector<8x256xf32>
    %72 = arith.addf %67, %71 : vector<8x256xf32>
    %c15_i32_41 = arith.constant 15 : i32
    %73 = tpu.dynamic_rotate %63 by %c15_i32_41 dim 1 : vector<8x256xf32>, i32 -> vector<8x256xf32>
    %c2_42 = arith.constant 2 : index
    %c0_43 = arith.constant 0 : index
    %c0_44 = arith.constant 0 : index
    %74 = vector.load %arg3[%c2_42, %c0_43, %c0_44] : memref<9x8x256xf32, #tpu.memory_space<vmem>>, vector<1x8x256xf32>
    %75 = vector.shape_cast %74 : vector<1x8x256xf32> to vector<8x256xf32>
    %76 = arith.mulf %73, %75 : vector<8x256xf32>
    %77 = arith.addf %72, %76 : vector<8x256xf32>
    %c1_i32_45 = arith.constant 1 : i32
    %78 = tpu.dynamic_rotate %63 by %c1_i32_45 dim 1 : vector<8x256xf32>, i32 -> vector<8x256xf32>
    %c3_46 = arith.constant 3 : index
    %c0_47 = arith.constant 0 : index
    %c0_48 = arith.constant 0 : index
    %79 = vector.load %arg3[%c3_46, %c0_47, %c0_48] : memref<9x8x256xf32, #tpu.memory_space<vmem>>, vector<1x8x256xf32>
    %80 = vector.shape_cast %79 : vector<1x8x256xf32> to vector<8x256xf32>
    %81 = arith.mulf %78, %80 : vector<8x256xf32>
    %82 = arith.addf %77, %81 : vector<8x256xf32>
    %c4_49 = arith.constant 4 : index
    %c0_50 = arith.constant 0 : index
    %c0_51 = arith.constant 0 : index
    %83 = vector.load %arg3[%c4_49, %c0_50, %c0_51] : memref<9x8x256xf32, #tpu.memory_space<vmem>>, vector<1x8x256xf32>
    %84 = vector.shape_cast %83 : vector<1x8x256xf32> to vector<8x256xf32>
    %85 = arith.mulf %63, %84 : vector<8x256xf32>
    %86 = arith.addf %82, %85 : vector<8x256xf32>
    %c255_i32_52 = arith.constant 255 : i32
    %87 = tpu.dynamic_rotate %63 by %c255_i32_52 dim 1 : vector<8x256xf32>, i32 -> vector<8x256xf32>
    %c5_53 = arith.constant 5 : index
    %c0_54 = arith.constant 0 : index
    %c0_55 = arith.constant 0 : index
    %88 = vector.load %arg3[%c5_53, %c0_54, %c0_55] : memref<9x8x256xf32, #tpu.memory_space<vmem>>, vector<1x8x256xf32>
    %89 = vector.shape_cast %88 : vector<1x8x256xf32> to vector<8x256xf32>
    %90 = arith.mulf %87, %89 : vector<8x256xf32>
    %91 = arith.addf %86, %90 : vector<8x256xf32>
    %c241_i32_56 = arith.constant 241 : i32
    %92 = tpu.dynamic_rotate %63 by %c241_i32_56 dim 1 : vector<8x256xf32>, i32 -> vector<8x256xf32>
    %c6_57 = arith.constant 6 : index
    %c0_58 = arith.constant 0 : index
    %c0_59 = arith.constant 0 : index
    %93 = vector.load %arg3[%c6_57, %c0_58, %c0_59] : memref<9x8x256xf32, #tpu.memory_space<vmem>>, vector<1x8x256xf32>
    %94 = vector.shape_cast %93 : vector<1x8x256xf32> to vector<8x256xf32>
    %95 = arith.mulf %92, %94 : vector<8x256xf32>
    %96 = arith.addf %91, %95 : vector<8x256xf32>
    %c240_i32_60 = arith.constant 240 : i32
    %97 = tpu.dynamic_rotate %63 by %c240_i32_60 dim 1 : vector<8x256xf32>, i32 -> vector<8x256xf32>
    %c7_61 = arith.constant 7 : index
    %c0_62 = arith.constant 0 : index
    %c0_63 = arith.constant 0 : index
    %98 = vector.load %arg3[%c7_61, %c0_62, %c0_63] : memref<9x8x256xf32, #tpu.memory_space<vmem>>, vector<1x8x256xf32>
    %99 = vector.shape_cast %98 : vector<1x8x256xf32> to vector<8x256xf32>
    %100 = arith.mulf %97, %99 : vector<8x256xf32>
    %101 = arith.addf %96, %100 : vector<8x256xf32>
    %c239_i32_64 = arith.constant 239 : i32
    %102 = tpu.dynamic_rotate %63 by %c239_i32_64 dim 1 : vector<8x256xf32>, i32 -> vector<8x256xf32>
    %c8_65 = arith.constant 8 : index
    %c0_66 = arith.constant 0 : index
    %c0_67 = arith.constant 0 : index
    %103 = vector.load %arg3[%c8_65, %c0_66, %c0_67] : memref<9x8x256xf32, #tpu.memory_space<vmem>>, vector<1x8x256xf32>
    %104 = vector.shape_cast %103 : vector<1x8x256xf32> to vector<8x256xf32>
    %105 = arith.mulf %102, %104 : vector<8x256xf32>
    %106 = arith.addf %101, %105 : vector<8x256xf32>
    %107 = arith.truncf %106 : vector<8x256xf32> to vector<8x256xbf16>
    %108 = arith.extf %107 : vector<8x256xbf16> to vector<8x256xf32>
    %109 = arith.subf %106, %108 : vector<8x256xf32>
    %c0_68 = arith.constant 0 : index
    %c0_69 = arith.constant 0 : index
    %c0_70 = arith.constant 0 : index
    %110 = vector.load %arg5[%c0_68, %c0_69, %c0_70] : memref<2x8x8xf32, #tpu.memory_space<vmem>>, vector<1x8x8xf32>
    %111 = vector.shape_cast %110 : vector<1x8x8xf32> to vector<8x8xf32>
    %c1_71 = arith.constant 1 : index
    %c0_72 = arith.constant 0 : index
    %c0_73 = arith.constant 0 : index
    %112 = vector.load %arg5[%c1_71, %c0_72, %c0_73] : memref<2x8x8xf32, #tpu.memory_space<vmem>>, vector<1x8x8xf32>
    %113 = vector.shape_cast %112 : vector<1x8x8xf32> to vector<8x8xf32>
    %cst_74 = arith.constant dense<0.000000e+00> : vector<8x256xf32>
    %114 = tpu.matmul %111, %108, %cst_74 {dimension_numbers = #tpu.dot_dimension_numbers<[1], [0], [0], [1], [0, 0, 1, 1], [], []>} : vector<8x8xf32>, vector<8x256xf32>, vector<8x256xf32> -> vector<8x256xf32>
    %cst_75 = arith.constant dense<0.000000e+00> : vector<8x256xf32>
    %115 = tpu.matmul %111, %109, %cst_75 {dimension_numbers = #tpu.dot_dimension_numbers<[1], [0], [0], [1], [0, 0, 1, 1], [], []>} : vector<8x8xf32>, vector<8x256xf32>, vector<8x256xf32> -> vector<8x256xf32>
    %116 = arith.addf %114, %115 : vector<8x256xf32>
    %cst_76 = arith.constant dense<0.000000e+00> : vector<8x256xf32>
    %117 = tpu.matmul %113, %108, %cst_76 {dimension_numbers = #tpu.dot_dimension_numbers<[1], [0], [0], [1], [0, 0, 1, 1], [], []>} : vector<8x8xf32>, vector<8x256xf32>, vector<8x256xf32> -> vector<8x256xf32>
    %118 = arith.addf %116, %117 : vector<8x256xf32>
    %c0_77 = arith.constant 0 : index
    %c0_78 = arith.constant 0 : index
    %119 = vector.load %arg7[%c0_77, %c0_78] : memref<8x1xf32, #tpu.memory_space<vmem>>, vector<8x1xf32>
    %120 = vector.broadcast %119 : vector<8x1xf32> to vector<8x256xf32>
    %121 = arith.addf %118, %120 : vector<8x256xf32>
    %c0_79 = arith.constant 0 : index
    %c0_80 = arith.constant 0 : index
    %c0_81 = arith.constant 0 : index
    %122 = vector.load %arg8[%c0_79, %c0_80, %c0_81] : memref<1x8x256xf32, #tpu.memory_space<vmem>>, vector<1x8x256xf32>
    %123 = vector.shape_cast %122 : vector<1x8x256xf32> to vector<8x256xf32>
    %124 = vector.shape_cast %121 : vector<8x256xf32> to vector<1x8x256xf32>
    tpu.vector_store %arg8[%c0_79, %c0_80, %c0_81], %124 {strides = array<i32>} : memref<1x8x256xf32, #tpu.memory_space<vmem>>, vector<1x8x256xf32>,
    return
  }
  func.func @transform_0(%arg0: i32) -> (i32, i32, i32) {
    %c0_i32 = arith.constant 0 : i32
    %c0_i32_0 = arith.constant 0 : i32
    %c0_i32_1 = arith.constant 0 : i32
    return %arg0, %c0_i32, %c0_i32_0 : i32, i32, i32
  }
  func.func @transform_1(%arg0: i32) -> (i32, i32, i32) {
    %c0_i32 = arith.constant 0 : i32
    %c0_i32_0 = arith.constant 0 : i32
    %c0_i32_1 = arith.constant 0 : i32
    %c0_i32_2 = arith.constant 0 : i32
    return %c0_i32, %c0_i32_0, %c0_i32_1 : i32, i32, i32
  }
  func.func @transform_2(%arg0: i32) -> (i32, i32, i32) {
    %c0_i32 = arith.constant 0 : i32
    %c0_i32_0 = arith.constant 0 : i32
    %c0_i32_1 = arith.constant 0 : i32
    %c0_i32_2 = arith.constant 0 : i32
    return %c0_i32, %c0_i32_0, %c0_i32_1 : i32, i32, i32
  }
  func.func @transform_3(%arg0: i32) -> (i32, i32, i32) {
    %c0_i32 = arith.constant 0 : i32
    %c0_i32_0 = arith.constant 0 : i32
    %c0_i32_1 = arith.constant 0 : i32
    %c0_i32_2 = arith.constant 0 : i32
    return %c0_i32, %c0_i32_0, %c0_i32_1 : i32, i32, i32
  }
  func.func @transform_4(%arg0: i32) -> (i32, i32, i32) {
    %c0_i32 = arith.constant 0 : i32
    %c0_i32_0 = arith.constant 0 : i32
    %c0_i32_1 = arith.constant 0 : i32
    %c0_i32_2 = arith.constant 0 : i32
    return %c0_i32, %c0_i32_0, %c0_i32_1 : i32, i32, i32
  }
  func.func @transform_5(%arg0: i32) -> (i32, i32) {
    %c0_i32 = arith.constant 0 : i32
    %c0_i32_0 = arith.constant 0 : i32
    %c0_i32_1 = arith.constant 0 : i32
    return %c0_i32, %c0_i32_0 : i32, i32
  }
  func.func @transform_6(%arg0: i32) -> (i32, i32) {
    %c0_i32 = arith.constant 0 : i32
    %c0_i32_0 = arith.constant 0 : i32
    %c0_i32_1 = arith.constant 0 : i32
    return %c0_i32, %c0_i32_0 : i32, i32
  }
  func.func @transform_7(%arg0: i32) -> (i32, i32, i32) {
    %c0_i32 = arith.constant 0 : i32
    %c0_i32_0 = arith.constant 0 : i32
    %c0_i32_1 = arith.constant 0 : i32
    return %arg0, %c0_i32, %c0_i32_0 : i32, i32, i32
  }
}

</mosaic_0001>

<bundles_post_ra>
// kernel: tile.29
= control target key start
LH: loop header
LB: loop body
LE: loop exit
PB: predicated region body
PF: predicated region fallthrough
CT: control target
= control target key end

     0   :  { %s22_s0 = inlined_call_operand.vmem [shape: f32[4], index: 0, kind: input, shape index: {}]   ;;  %s23_s1 = inlined_call_operand.vmem [shape: f32[2,4], index: 1, kind: output, shape index: {}]  }
   0x1   :  { %v4_v0 = vld [vmem:[%s22_s0] ss:$0 sm:$0xff] }
   0x2   :  { %5 = vst [vmem:[%s23_s1] sm:$0x3] %v4_v0 }

// kernel: tile.0
= control target key start
LH: loop header
LB: loop body
LE: loop exit
PB: predicated region body
PF: predicated region fallthrough
CT: control target
= control target key end

     0   :  { %s34_s8 = smov 125   ;;  %vm7_vm0 = vcmask 7168   ;;  %s35_s11 = smov 126   ;;  %s61_s0 = inlined_call_operand.vmem [shape: f32[2,4], index: 0, kind: input, shape index: {}]   ;;  %s62_s1 = inlined_call_operand.vmem [shape: f32[8,1], index: 1, kind: output, shape index: {}]  }
   0x1   :  { %v4_v0 = vld [vmem:[%s61_s0] sm:$0x3]  ;;  %s33_s0 = smov 127  }
   0x2   :  { %5 = vst [vmem:[#allocation0] sm:$0x3] %v4_v0 }
   0x9   :  { %v9_v1 = vld [vmem:[#allocation0] sm:$0x3]  }
   0xa   :  { %v21_v2 = vld [vmem:[#allocation0] sm:$0x3]   ;;  %10 = vrot.lane.b32.xlu0 %v9_v1, %s33_s0 }
   0xb   :  { %22 = vrot.lane.b32.xlu1 %v21_v2, %s34_s8  ;;  %v6_v3 = vld [vmem:[#allocation0] sm:$0x3]  }
   0xc   :  { %v15_v4 = vld [vmem:[#allocation0] sm:$0x3]   ;;  %8 = vst.msk [vmem:[%s62_s1] ss:$4 sm:$0x3] %vm7_vm0, %v6_v3  }
   0xe   :  { %16 = vrot.lane.b32.xlu0 %v15_v4, %s35_s11 }
  0x7c   :  { %v11_v5 = vpop.permute.xlu0 %10  }
  0x7d   :  { %v23_v6 = vpop.permute.xlu1 %22   ;;  %27 = vst.msk [vmem:[%s62_s1 + $0x1] ss:$4 sm:$0x3] %vm7_vm0, %v11_v5  }
  0x7e   :  { %29 = vst.msk [vmem:[%s62_s1 + $0x3] ss:$4 sm:$0x3] %vm7_vm0, %v23_v6  }
  0x80   :  { %v17_v7 = vpop.permute.xlu0 %16  }
  0x81   :  { %28 = vst.msk [vmem:[%s62_s1 + $0x2] ss:$4 sm:$0x3] %vm7_vm0, %v17_v7  }

// kernel: sep_conv_forward.1
= control target key start
LH: loop header
LB: loop body
LE: loop exit
PB: predicated region body
PF: predicated region fallthrough
CT: control target
= control target key end

     0   :  { %s800_s28 = smov 16   ;;  %s801_s29 = smov 17   ;;  %v807_v4 = vmov 0.0   ;;  %v809_v5 = vmov 0   ;;  %v34_v7 = vlaneseq  ;;  %vm157_vm8 = vcmask 64512   ;;  %s1150_s0 = inlined_call_operand.vmem [shape: f32[1,8,256], index: 0, kind: input, shape index: {}]   ;;  %s1151_s5 = inlined_call_operand.vmem [shape: f32[8,1], index: 5, kind: input, shape index: {}]   ;;  %s1152_s1 = inlined_call_operand.vmem [shape: f32[9,8,256], index: 1, kind: input, shape index: {}]   ;;  %s1153_s3 = inlined_call_operand.vmem [shape: f32[2,8,8], index: 3, kind: input, shape index: {}]   ;;  %s1154_s6 = inlined_call_operand.vmem [shape: f32[8,1], index: 6, kind: input, shape index: {}]   ;;  %s1155_s2 = inlined_call_operand.vmem [shape: f32[9,8,256], index: 2, kind: input, shape index: {}]   ;;  %s1156_s4 = inlined_call_operand.vmem [shape: f32[2,8,8], index: 4, kind: input, shape index: {}]   ;;  %s1157_s7 = inlined_call_operand.vmem [shape: f32[1,8,256], index: 7, kind: output, shape index: {}]  }
   0x1   :  { %v26_v0 = vld [vmem:[%s1150_s0] sm:$0xff]  ;;  %v27_v1 = vld [vmem:[%s1150_s0 + $0x8] sm:$0xff]  ;;  %s802_s30 = smov 15   ;;  %s803_s0 = smov 1   ;;  %225 = vmatprep.mubr.f32.mxu0 %v807_v4  ;;  %573 = vmatprep.mubr.f32.mxu1 %v807_v4  ;;  %v741_v13 = vld [vmem:[%s1152_s1 + $0x10] sm:$0xff] }
   0x2   :  { %v856_v2 = vmax.f32 %v26_v0, 0.0  ;;  %v862_v3 = vmax.f32 %v27_v1, 0.0  ;;  %s804_s8 = smov 127   ;;  %s805_s9 = smov 113   ;;  %799 = vset.pattern.permute.xlu0 %v809_v5  ;;  %v379_v6 = vld [vmem:[%s1151_s5] sm:$0xff]  ;;  %v897_v10 = vand.u32 127, %v34_v7 }
   0x3   :  { %s806_s10 = smov 112   ;;  %s808_s11 = smov 111   ;;  %v742_v14 = vld [vmem:[%s1152_s1 + $0x18] sm:$0xff]  ;;  %v39_v17 = vld [vmem:[%s1152_s1] sm:$0xff]  ;;  %v40_v18 = vld [vmem:[%s1152_s1 + $0x8] sm:$0xff] }
   0x4   :  { %43 = vrot.lane.b32.xlu1 %v856_v2, %s800_s28  ;;  %30 = vrot.lane.b32.xlu0 %v856_v2, %s801_s29  ;;  %vm47_vm0 = vcmp.lt.s32.totalorder %v897_v10, 16  ;;  %vm36_vm1 = vcmp.lt.s32.totalorder %v897_v10, 17  ;;  %vm61_vm2 = vcmp.lt.s32.totalorder %v897_v10, 15  ;;  %v743_v23 = vld [vmem:[%s1152_s1 + $0x20] sm:$0xff]  ;;  %v744_v24 = vld [vmem:[%s1152_s1 + $0x28] sm:$0xff]  ;;  %vm75_vm3 = vcmp.lt.s32.totalorder %v897_v10, 1 }
   0x5   :  { %v745_v31 = vld [vmem:[%s1152_s1 + $0x30] sm:$0xff]  ;;  %v746_v32 = vld [vmem:[%s1152_s1 + $0x38] sm:$0xff]  ;;  %v748_v43 = vld [vmem:[%s1152_s1 + $0x48] sm:$0xff]  ;;  %vm96_vm4 = vcmp.lt.s32.totalorder %v897_v10, 127  ;;  %vm110_vm5 = vcmp.lt.s32.totalorder %v897_v10, 113  ;;  %vm124_vm6 = vcmp.lt.s32.totalorder %v897_v10, 112 }
   0x6   :  { %v747_v44 = vld [vmem:[%s1152_s1 + $0x40] sm:$0xff]  ;;  %v89_v49 = vmul.f32 %v748_v43, %v862_v3  ;;  %v749_v53 = vld [vmem:[%s1152_s1 + $0x50] sm:$0xff]  ;;  %v750_v54 = vld [vmem:[%s1152_s1 + $0x58] sm:$0xff]  ;;  %vm138_vm7 = vcmp.lt.s32.totalorder %v897_v10, 111 }
   0x7   :  { %v88_v52 = vmul.f32 %v747_v44, %v856_v2  ;;  %v751_v59 = vld [vmem:[%s1152_s1 + $0x60] sm:$0xff]  ;;  %v752_v60 = vld [vmem:[%s1152_s1 + $0x68] sm:$0xff]  ;;  %v754_v5 = vld [vmem:[%s1152_s1 + $0x78] sm:$0xff] }
   0x8   :  { %45 = vrot.lane.b32.xlu1 %v862_v3, %s800_s28  ;;  %32 = vrot.lane.b32.xlu0 %v862_v3, %s801_s29  ;;  %v777_v10 = vld [vmem:[%s1156_s4 + $0x8] sm:$0xff] }
   0xc   :  { %59 = vrot.lane.b32.xlu1 %v862_v3, %s802_s30  ;;  %57 = vrot.lane.b32.xlu0 %v856_v2, %s802_s30 }
  0x10   :  { %73 = vrot.lane.b32.xlu1 %v862_v3, %s803_s0  ;;  %71 = vrot.lane.b32.xlu0 %v856_v2, %s803_s0 }
  0x14   :  { %94 = vrot.lane.b32.xlu1 %v862_v3, %s804_s8  ;;  %92 = vrot.lane.b32.xlu0 %v856_v2, %s804_s8 }
  0x18   :  { %108 = vrot.lane.b32.xlu1 %v862_v3, %s805_s9  ;;  %106 = vrot.lane.b32.xlu0 %v856_v2, %s805_s9 }
  0x1c   :  { %122 = vrot.lane.b32.xlu1 %v862_v3, %s806_s10  ;;  %120 = vrot.lane.b32.xlu0 %v856_v2, %s806_s10 }
  0x20   :  { %136 = vrot.lane.b32.xlu1 %v862_v3, %s808_s11  ;;  %134 = vrot.lane.b32.xlu0 %v856_v2, %s808_s11  ;;  %v753_v3 = vld [vmem:[%s1152_s1 + $0x70] sm:$0xff] }
  0x24   :  { %382 = vperm.xlu0 %799, %v379_v6  }
  0x76   :  { %v44_v8 = vpop.permute.xlu1 %43  ;;  %v31_v9 = vpop.permute.xlu0 %30 }
  0x7a   :  { %v46_v11 = vpop.permute.xlu1 %45  ;;  %v33_v12 = vpop.permute.xlu0 %32 }
  0x7b   :  { %v48_v15 = vsel %vm47_vm0, %v44_v8, %v46_v11  ;;  %v49_v16 = vsel %vm47_vm0, %v46_v11, %v44_v8  ;;  %v37_v19 = vsel %vm36_vm1, %v31_v9, %v33_v12  ;;  %v38_v20 = vsel %vm36_vm1, %v33_v12, %v31_v9 }
  0x7c   :  { %v53_v27 = vmul.f32 %v741_v13, %v49_v16  ;;  %v54_v28 = vmul.f32 %v742_v14, %v48_v15  ;;  %v41_v29 = vmul.f32 %v39_v17, %v38_v20  ;;  %v42_v30 = vmul.f32 %v40_v18, %v37_v19  ;;  %v755_v17 = vld [vmem:[%s1152_s1 + $0x80] sm:$0xff]  ;;  %v756_v18 = vld [vmem:[%s1152_s1 + $0x88] sm:$0xff] }
  0x7e   :  { %v60_v21 = vpop.permute.xlu1 %59  ;;  %v58_v22 = vpop.permute.xlu0 %57  ;;  %v55_v39 = vadd.f32 %v53_v27, %v41_v29  ;;  %v56_v40 = vadd.f32 %v54_v28, %v42_v30 }
  0x7f   :  { %v62_v25 = vsel %vm61_vm2, %v58_v22, %v60_v21  ;;  %v63_v26 = vsel %vm61_vm2, %v60_v21, %v58_v22 }
  0x80   :  { %v67_v33 = vmul.f32 %v743_v23, %v63_v26  ;;  %v68_v34 = vmul.f32 %v744_v24, %v62_v25 }
  0x82   :  { %v74_v35 = vpop.permute.xlu1 %73  ;;  %v72_v36 = vpop.permute.xlu0 %71  ;;  %v69_v45 = vadd.f32 %v67_v33, %v55_v39  ;;  %v70_v46 = vadd.f32 %v68_v34, %v56_v40 }
  0x83   :  { %v76_v37 = vsel %vm75_vm3, %v72_v36, %v74_v35  ;;  %v77_v38 = vsel %vm75_vm3, %v74_v35, %v72_v36 }
  0x84   :  { %v81_v41 = vmul.f32 %v745_v31, %v77_v38  ;;  %v82_v42 = vmul.f32 %v746_v32, %v76_v37  ;;  %v154_v37 = vld [vmem:[%s1153_s3] sm:$0xff]  ;;  %v757_v38 = vld [vmem:[%s1153_s3 + $0x8] sm:$0xff] }
  0x86   :  { %v95_v47 = vpop.permute.xlu1 %94  ;;  %v93_v48 = vpop.permute.xlu0 %92  ;;  %v83_v50 = vadd.f32 %v81_v41, %v69_v45  ;;  %v84_v51 = vadd.f32 %v82_v42, %v70_v46  ;;  %v727_v46 = vld [vmem:[%s1154_s6] sm:$0xff] }
  0x87   :  { %v97_v55 = vsel %vm96_vm4, %v93_v48, %v95_v47  ;;  %v98_v56 = vsel %vm96_vm4, %v95_v47, %v93_v48 }
  0x88   :  { %v91_v63 = vadd.f32 %v89_v49, %v84_v51  ;;  %v90_v0 = vadd.f32 %v88_v52, %v83_v50  ;;  %v102_v1 = vmul.f32 %v749_v53, %v97_v55  ;;  %v103_v2 = vmul.f32 %v750_v54, %v98_v56  ;;  %v761_v53 = vld [vmem:[%s1155_s2 + $0x10] sm:$0xff]  ;;  %v762_v54 = vld [vmem:[%s1155_s2 + $0x18] sm:$0xff] }
  0x8a   :  { %v109_v57 = vpop.permute.xlu1 %108  ;;  %v107_v58 = vpop.permute.xlu0 %106  ;;  %v104_v13 = vadd.f32 %v102_v1, %v90_v0  ;;  %v105_v14 = vadd.f32 %v103_v2, %v91_v63  ;;  %v764_v63 = vld [vmem:[%s1155_s2 + $0x28] sm:$0xff] }
  0x8b   :  { %v111_v61 = vsel %vm110_vm5, %v107_v58, %v109_v57  ;;  %v112_v62 = vsel %vm110_vm5, %v109_v57, %v107_v58  ;;  %v395_v57 = vld [vmem:[%s1155_s2] sm:$0xff] }
  0x8c   :  { %v116_v6 = vmul.f32 %v751_v59, %v111_v61  ;;  %v117_v7 = vmul.f32 %v752_v60, %v112_v62  ;;  %v396_v59 = vld [vmem:[%s1155_s2 + $0x8] sm:$0xff]  ;;  %v763_v62 = vld [vmem:[%s1155_s2 + $0x20] sm:$0xff] }
  0x8e   :  { %v123_v8 = vpop.permute.xlu1 %122  ;;  %v121_v9 = vpop.permute.xlu0 %120  ;;  %v118_v19 = vadd.f32 %v116_v6, %v104_v13  ;;  %v119_v20 = vadd.f32 %v117_v7, %v105_v14  ;;  %v765_v6 = vld [vmem:[%s1155_s2 + $0x30] sm:$0xff]  ;;  %v766_v7 = vld [vmem:[%s1155_s2 + $0x38] sm:$0xff] }
  0x8f   :  { %v125_v11 = vsel %vm124_vm6, %v121_v9, %v123_v8  ;;  %v126_v12 = vsel %vm124_vm6, %v123_v8, %v121_v9 }
  0x90   :  { %v130_v15 = vmul.f32 %v753_v3, %v125_v11  ;;  %v131_v16 = vmul.f32 %v754_v5, %v126_v12 }
  0x92   :  { %v137_v21 = vpop.permute.xlu1 %136  ;;  %v135_v22 = vpop.permute.xlu0 %134  ;;  %v132_v25 = vadd.f32 %v130_v15, %v118_v19  ;;  %v133_v28 = vadd.f32 %v131_v16, %v119_v20 }
  0x93   :  { %v139_v23 = vsel %vm138_vm7, %v135_v22, %v137_v21  ;;  %v140_v24 = vsel %vm138_vm7, %v137_v21, %v135_v22 }
  0x94   :  { %v144_v26 = vmul.f32 %v755_v17, %v139_v23  ;;  %v145_v27 = vmul.f32 %v756_v18, %v140_v24  ;;  %v767_v24 = vld [vmem:[%s1155_s2 + $0x40] sm:$0xff] }
  0x96   :  { %v147_v29 = vadd.f32 %v145_v27, %v133_v28  ;;  %v146_v30 = vadd.f32 %v144_v26, %v132_v25  ;;  %v768_v25 = vld [vmem:[%s1155_s2 + $0x48] sm:$0xff]  ;;  %v769_v28 = vld [vmem:[%s1155_s2 + $0x50] sm:$0xff] }
  0x98   :  { %v149_v31 = vpack.c.bf16 %v147_v29, %v147_v29  ;;  %v148_v32 = vpack.c.bf16 %v146_v30, %v146_v30 }
  0x9a   :  { %v151_v33 = vunpack.c.l.bf16 %v149_v31  ;;  %v150_v34 = vunpack.c.l.bf16 %v148_v32 }
  0x9c   :  { %v153_v35 = vsub.f32 %v147_v29, %v151_v33  ;;  %v152_v36 = vsub.f32 %v146_v30, %v150_v34  ;;  %v770_v29 = vld [vmem:[%s1155_s2 + $0x58] sm:$0xff] }
  0x9e   :  { %161 = vmatprep.subr.mxu0 %v153_v35  ;;  %v771_v35 = vld [vmem:[%s1155_s2 + $0x60] sm:$0xff] }
  0x9f   :  { %162 = vmatpush1.msra.mxu0 %v152_v36  ;;  %v772_v36 = vld [vmem:[%s1155_s2 + $0x68] sm:$0xff] }
  0xa0   :  { %758 = vmatmul.mubr.msk.f32.vlgmr.msra.gmra.mrb[0].mxu0 %vm157_vm8, %v154_v37  ;;  %232 = vmatprep.subr.mxu0 %v151_v33 }
  0xa1   :  { %233 = vmatpush1.msra.mxu0 %v150_v34  ;;  %296 = vmatprep.mubr.f32.mxu0 %v807_v4 }
  0xa2   :  { %306 = vmatprep.subr.mxu0 %v151_v33 }
  0xa3   :  { %v383_v39 = vpop.permute.xlu0 %382 }
  0xa8   :  { %759 = vmatmul.mubr.msk.f32.vlgmr.msra.gmra.mrb[0].mxu0 %vm157_vm8, %v154_v37 }
  0xa9   :  { %307 = vmatpush1.msra.mxu0 %v150_v34  ;;  %370 = vmatprep.mubr.f32.mxu0 %v807_v4 }
  0xb0   :  { %760 = vmatmul.mubr.msk.f32.vlgmr.msra.gmra.mrb[0].mxu0 %vm157_vm8, %v757_v38 }
 0x183   :  { %v372_v40 = vpop.f32.mrb[0].mxu0 }
 0x184   :  { %v385_v41 = vadd.f32 %v383_v39, %v372_v40  ;;  %v374_v42 = vpop.f32.mrb[1].mxu0 }
 0x185   :  { %v386_v44 = vadd.f32 %v383_v39, %v374_v42 }
 0x186   :  { %v1006_v43 = vmax.f32 %v385_v41, 0.0 }
 0x187   :  { %v1012_v45 = vmax.f32 %v386_v44, 0.0  ;;  %v773_v44 = vld [vmem:[%s1155_s2 + $0x70] sm:$0xff] }
 0x188   :  { %399 = vrot.lane.b32.xlu0 %v1006_v43, %s800_s28  ;;  %389 = vrot.lane.b32.xlu1 %v1006_v43, %s801_s29  ;;  %v441_v32 = vmul.f32 %v767_v24, %v1006_v43 }
 0x189   :  { %v442_v33 = vmul.f32 %v768_v25, %v1012_v45 }
 0x18c   :  { %412 = vrot.lane.b32.xlu0 %v1006_v43, %s802_s30  ;;  %391 = vrot.lane.b32.xlu1 %v1012_v45, %s801_s29 }
 0x190   :  { %425 = vrot.lane.b32.xlu0 %v1006_v43, %s803_s0  ;;  %401 = vrot.lane.b32.xlu1 %v1012_v45, %s800_s28 }
 0x194   :  { %445 = vrot.lane.b32.xlu0 %v1006_v43, %s804_s8  ;;  %414 = vrot.lane.b32.xlu1 %v1012_v45, %s802_s30 }
 0x198   :  { %458 = vrot.lane.b32.xlu0 %v1006_v43, %s805_s9  ;;  %427 = vrot.lane.b32.xlu1 %v1012_v45, %s803_s0 }
 0x19c   :  { %471 = vrot.lane.b32.xlu0 %v1006_v43, %s806_s10  ;;  %447 = vrot.lane.b32.xlu1 %v1012_v45, %s804_s8 }
 0x1a0   :  { %484 = vrot.lane.b32.xlu0 %v1006_v43, %s808_s11  ;;  %460 = vrot.lane.b32.xlu1 %v1012_v45, %s805_s9 }
 0x1a4   :  { %730 = vperm.xlu0 %799, %v727_v46   ;;  %473 = vrot.lane.b32.xlu1 %v1012_v45, %s806_s10 }
 0x1a8   :  { %486 = vrot.lane.b32.xlu1 %v1012_v45, %s808_s11  ;;  %v774_v45 = vld [vmem:[%s1155_s2 + $0x78] sm:$0xff] }
 0x1fa   :  { %v400_v47 = vpop.permute.xlu0 %399  ;;  %v390_v48 = vpop.permute.xlu1 %389 }
 0x1fe   :  { %v413_v49 = vpop.permute.xlu0 %412  ;;  %v392_v50 = vpop.permute.xlu1 %391 }
 0x1ff   :  { %v393_v60 = vsel %vm36_vm1, %v390_v48, %v392_v50  ;;  %v394_v61 = vsel %vm36_vm1, %v392_v50, %v390_v48 }
 0x200   :  { %v397_v8 = vmul.f32 %v395_v57, %v394_v61  ;;  %v398_v9 = vmul.f32 %v396_v59, %v393_v60 }
 0x202   :  { %v426_v51 = vpop.permute.xlu0 %425  ;;  %v402_v52 = vpop.permute.xlu1 %401 }
 0x203   :  { %v403_v55 = vsel %vm47_vm0, %v400_v47, %v402_v52  ;;  %v404_v56 = vsel %vm47_vm0, %v402_v52, %v400_v47 }
 0x204   :  { %v408_v2 = vmul.f32 %v761_v53, %v404_v56  ;;  %v409_v3 = vmul.f32 %v762_v54, %v403_v55  ;;  %v775_v55 = vld [vmem:[%s1155_s2 + $0x80] sm:$0xff]  ;;  %v776_v56 = vld [vmem:[%s1155_s2 + $0x88] sm:$0xff] }
 0x206   :  { %v415_v58 = vpop.permute.xlu1 %414  ;;  %v446_v5 = vpop.permute.xlu0 %445  ;;  %v410_v16 = vadd.f32 %v408_v2, %v397_v8  ;;  %v411_v17 = vadd.f32 %v409_v3, %v398_v9 }
 0x207   :  { %v416_v0 = vsel %vm61_vm2, %v413_v49, %v415_v58  ;;  %v417_v1 = vsel %vm61_vm2, %v415_v58, %v413_v49 }
 0x208   :  { %v421_v11 = vmul.f32 %v763_v62, %v417_v1  ;;  %v422_v12 = vmul.f32 %v764_v63, %v416_v0 }
 0x20a   :  { %v428_v13 = vpop.permute.xlu1 %427  ;;  %v423_v20 = vadd.f32 %v421_v11, %v410_v16  ;;  %v424_v21 = vadd.f32 %v422_v12, %v411_v17  ;;  %v459_v22 = vpop.permute.xlu0 %458 }
 0x20b   :  { %v429_v14 = vsel %vm75_vm3, %v426_v51, %v428_v13  ;;  %v430_v15 = vsel %vm75_vm3, %v428_v13, %v426_v51  ;;  %v503_v13 = vld [vmem:[%s1156_s4] sm:$0xff] }
 0x20c   :  { %v434_v18 = vmul.f32 %v765_v6, %v430_v15  ;;  %v435_v19 = vmul.f32 %v766_v7, %v429_v14 }
 0x20e   :  { %v448_v23 = vpop.permute.xlu1 %447  ;;  %v436_v26 = vadd.f32 %v434_v18, %v423_v20  ;;  %v437_v27 = vadd.f32 %v435_v19, %v424_v21  ;;  %v472_v39 = vpop.permute.xlu0 %471 }
 0x20f   :  { %v449_v30 = vsel %vm96_vm4, %v446_v5, %v448_v23  ;;  %v450_v31 = vsel %vm96_vm4, %v448_v23, %v446_v5 }
 0x210   :  { %v443_v40 = vadd.f32 %v441_v32, %v436_v26  ;;  %v444_v41 = vadd.f32 %v442_v33, %v437_v27  ;;  %v454_v42 = vmul.f32 %v769_v28, %v449_v30  ;;  %v455_v43 = vmul.f32 %v770_v29, %v450_v31 }
 0x212   :  { %v461_v34 = vpop.permute.xlu1 %460  ;;  %v456_v51 = vadd.f32 %v454_v42, %v443_v40  ;;  %v457_v52 = vadd.f32 %v455_v43, %v444_v41  ;;  %v485_v57 = vpop.permute.xlu0 %484 }
 0x213   :  { %v462_v37 = vsel %vm110_vm5, %v459_v22, %v461_v34  ;;  %v463_v38 = vsel %vm110_vm5, %v461_v34, %v459_v22 }
 0x214   :  { %v467_v46 = vmul.f32 %v771_v35, %v462_v37  ;;  %v468_v47 = vmul.f32 %v772_v36, %v463_v38 }
 0x216   :  { %v474_v48 = vpop.permute.xlu1 %473  ;;  %v469_v58 = vadd.f32 %v467_v46, %v456_v51  ;;  %v470_v59 = vadd.f32 %v468_v47, %v457_v52 }
 0x217   :  { %v475_v49 = vsel %vm124_vm6, %v472_v39, %v474_v48  ;;  %v476_v50 = vsel %vm124_vm6, %v474_v48, %v472_v39 }
 0x218   :  { %v480_v53 = vmul.f32 %v773_v44, %v475_v49  ;;  %v481_v54 = vmul.f32 %v774_v45, %v476_v50 }
 0x21a   :  { %v487_v60 = vpop.permute.xlu1 %486  ;;  %v482_v63 = vadd.f32 %v480_v53, %v469_v58  ;;  %v483_v2 = vadd.f32 %v481_v54, %v470_v59 }
 0x21b   :  { %v488_v61 = vsel %vm138_vm7, %v485_v57, %v487_v60  ;;  %v489_v62 = vsel %vm138_vm7, %v487_v60, %v485_v57 }
 0x21c   :  { %v493_v0 = vmul.f32 %v775_v55, %v488_v61  ;;  %v494_v1 = vmul.f32 %v776_v56, %v489_v62 }
 0x21e   :  { %v496_v3 = vadd.f32 %v494_v1, %v483_v2  ;;  %v495_v5 = vadd.f32 %v493_v0, %v482_v63 }
 0x220   :  { %v498_v6 = vpack.c.bf16 %v496_v3, %v496_v3  ;;  %v497_v7 = vpack.c.bf16 %v495_v5, %v495_v5 }
 0x222   :  { %v500_v8 = vunpack.c.l.bf16 %v498_v6  ;;  %v499_v9 = vunpack.c.l.bf16 %v497_v7 }
 0x223   :  { %v731_v14 = vpop.permute.xlu0 %730 }
 0x224   :  { %v502_v11 = vsub.f32 %v496_v3, %v500_v8  ;;  %v501_v12 = vsub.f32 %v495_v5, %v499_v9 }
 0x226   :  { %509 = vmatprep.subr.mxu1 %v502_v11 }
 0x227   :  { %510 = vmatpush1.msra.mxu1 %v501_v12 }
 0x228   :  { %778 = vmatmul.mubr.msk.f32.vlgmr.msra.gmra.mrb[0].mxu1 %vm157_vm8, %v503_v13  ;;  %580 = vmatprep.subr.mxu1 %v500_v8 }
 0x229   :  { %581 = vmatpush1.msra.mxu1 %v499_v9  ;;  %644 = vmatprep.mubr.f32.mxu1 %v807_v4 }
 0x22a   :  { %654 = vmatprep.subr.mxu1 %v500_v8 }
 0x230   :  { %779 = vmatmul.mubr.msk.f32.vlgmr.msra.gmra.mrb[0].mxu1 %vm157_vm8, %v503_v13 }
 0x231   :  { %655 = vmatpush1.msra.mxu1 %v499_v9  ;;  %718 = vmatprep.mubr.f32.mxu1 %v807_v4 }
 0x238   :  { %780 = vmatmul.mubr.msk.f32.vlgmr.msra.gmra.mrb[0].mxu1 %vm157_vm8, %v777_v10 }
 0x30b   :  { %v720_v15 = vpop.f32.mrb[0].mxu1 }
 0x30c   :  { %v733_v16 = vadd.f32 %v731_v14, %v720_v15  ;;  %v722_v17 = vpop.f32.mrb[1].mxu1 }
 0x30d   :  { %v734_v18 = vadd.f32 %v731_v14, %v722_v17 }
 0x30e   :  { %735 = vst [vmem:[%s1157_s7] sm:$0xff] %v733_v16 }
 0x30f   :  { %736 = vst [vmem:[%s1157_s7 + $0x8] sm:$0xff] %v734_v18 }

</bundles_post_ra>
